<compile_context>
chip_gen: v7x
topology: tpu7x:2x2x1
jax: 0.10.0
libtpu: 0.0.40
codegen_flags: <defaults>
</compile_context>

<pallas_src>
import functools

import jax
import jax.numpy as jnp
from jax.experimental import pallas as pl
from jax.experimental.pallas import tpu as pltpu


def _round_up(x, m):
    return ((x + m - 1) // m) * m


def _pick_tile_n(H, want):
    """Largest multiple of 128 (<= want) that divides H."""
    t = min(want, H)
    t = max(128, (t // 128) * 128)
    while t > 128 and H % t != 0:
        t -= 128
    return t


def _device_defaults():
    """(tile_m, tile_n) defaults per TPU generation (roofline-driven)."""
    kind = ""
    try:
        kind = jax.devices()[0].device_kind.lower()
    except Exception:
        pass
    if "v5e" in kind or "v5 lite" in kind or "v5lite" in kind:
        return 256, 1024     # ridge ~240 flop/B; wide N amortizes grid steps
    if "v6" in kind:
        return 768, 512      # ridge ~650 flop/B; needs big row tile
    if "v7" in kind:
        return 512, 512      # ridge ~310 flop/B; 64 MiB VMEM per TC
    return 512, 512


def _vmem_capacity_bytes():
    try:
        return int(pltpu.get_tpu_info().vmem_capacity_bytes)
    except Exception:
        return 64 << 20      # conservative (v7x per-TC) fallback


def _lambda_kernel(x_ref, w_ref, b_ref, o_ref, xb_ref, *, tile_n):
    # Refresh the bf16 copy of the f32 x row block once per row tile
    # (j == 0 <=> a new i block just arrived; j axis is "arbitrary").
    @pl.when(pl.program_id(1) == 0)
    def _():
        xb_ref[...] = x_ref[...].astype(jnp.bfloat16)

    # MXU path: bf16 x bf16 -> f32 accumulation.
    y = jnp.dot(xb_ref[...], w_ref[...].astype(jnp.bfloat16),
                preferred_element_type=jnp.float32)

    # Residual columns for this output tile, sliced from the resident f32
    # row block (aligned dynamic lane offset; no extra DMA stream).
    j = pl.program_id(1)
    col0 = pl.multiple_of(j * tile_n, 128)
    res = x_ref[:, pl.ds(col0, tile_n)].astype(jnp.float32)

    # Fused f32 epilogue: residual + bias, lane-dense store.
    o_ref[...] = (res + y + b_ref[...].astype(jnp.float32)).astype(o_ref.dtype)


def lambda_skip_linear(x, w, b, *, tile_m=None, tile_n=None):
    """out = x + (x @ w + b), fused in one Pallas kernel.

    x: [M, H] (f32), w: [H, H] (ideally pre-cast bf16), b: [1, H] (f32).
    Matmul runs in bf16 on the MXU with f32 accumulation; residual and bias
    are added in f32.
    """
    M, H = x.shape
    assert w.shape == (H, H) and b.shape == (1, H)
    assert H % 128 == 0, "hidden dim must be a multiple of 128 (lane alignment)"

    dm, dn = _device_defaults()
    tile_m = dm if tile_m is None else tile_m
    tile_n = dn if tile_n is None else tile_n

    tile_n = _pick_tile_n(H, tile_n)
    # Row tile: never bigger than the 16-aligned token count (bf16 packing).
    tile_m = _round_up(max(16, min(tile_m, _round_up(M, 16))), 16)

    # VMEM budget: queried capacity minus headroom, capped at ~100 MiB.
    cap = min(max(_vmem_capacity_bytes() - (16 << 20), 32 << 20), 100 << 20)

    x_bytes = jnp.dtype(x.dtype).itemsize
    w_bytes = jnp.dtype(w.dtype).itemsize
    b_bytes = jnp.dtype(b.dtype).itemsize
    o_bytes = x_bytes

    def vmem_bytes(tm, tn):
        return (2 * tm * H * x_bytes      # x row block (double-buffered)
                + tm * H * 2              # bf16 scratch copy of the row block
                + 2 * H * tn * w_bytes    # W N-tile
                + 2 * tn * b_bytes        # bias tile
                + 2 * tm * tn * o_bytes)  # output tile

    # Shrink tile_m first (dominant term at large H), then tile_n, to fit.
    while vmem_bytes(tile_m, tile_n) > cap and tile_m > 16:
        tile_m = max(16, _round_up(tile_m // 2, 16))
    while vmem_bytes(tile_m, tile_n) > cap and tile_n > 128:
        tile_n = _pick_tile_n(H, tile_n - 128)

    grid = (pl.cdiv(M, tile_m), H // tile_n)
    vmem_limit = int(min(max(vmem_bytes(tile_m, tile_n) + (8 << 20), 32 << 20),
                         cap))

    kernel = functools.partial(_lambda_kernel, tile_n=tile_n)

    return pl.pallas_call(
        kernel,
        out_shape=jax.ShapeDtypeStruct((M, H), x.dtype),
        grid_spec=pltpu.PrefetchScalarGridSpec(
            num_scalar_prefetch=0,
            grid=grid,
            in_specs=[
                # Full-H f32 row block; index constant over j, so it is only
                # re-DMA'd when the row tile changes.
                pl.BlockSpec((tile_m, H), lambda i, j: (i, 0)),
                # W tiled along out-features (VMEM bounded independent of H).
                pl.BlockSpec((H, tile_n), lambda i, j: (0, j)),
                # Bias tile.
                pl.BlockSpec((1, tile_n), lambda i, j: (0, j)),
            ],
            out_specs=pl.BlockSpec((tile_m, tile_n), lambda i, j: (i, j)),
            scratch_shapes=[pltpu.VMEM((tile_m, H), jnp.bfloat16)],
        ),
        compiler_params=pltpu.CompilerParams(
            # Split the row (i) axis across TensorCores; j stays sequential so
            # the per-row-tile bf16 scratch refresh under pl.when is valid.
            dimension_semantics=("parallel", "arbitrary"),
            vmem_limit_bytes=vmem_limit,
        ),
    )(x, w, b)


if __name__ == "__main__":
    key = jax.random.PRNGKey(0)
    kx, kw, kb = jax.random.split(key, 3)

    # Small smoke-test shapes; M=18 is deliberately not tile-aligned so the
    # ragged last row block (no host-side padding) is exercised.
    batch, seq, hidden = 2, 9, 256
    M = batch * seq

    x = jax.random.normal(kx, (M, hidden), dtype=jnp.float32)
    # Deterministic "Linear(hidden, hidden)" parameters (synthetic init).
    w = jax.random.normal(kw, (hidden, hidden), dtype=jnp.float32) * (hidden ** -0.5)
    b = jax.random.normal(kb, (1, hidden), dtype=jnp.float32) * 0.01

    # Cast W to bf16 ONCE, outside the hot path (kernel consumes bf16 weights).
    wb = w.astype(jnp.bfloat16)

    # tile_m=16 / tile_n=128 -> (2, 2) grid: exercises the ragged last row
    # block, the per-row-tile bf16 refresh, and the dynamic residual slice.
    out = lambda_skip_linear(x, wb, b, tile_m=16, tile_n=128)
    jax.block_until_ready(out)

    # Reference with the same bf16 quantization of x/W on the matmul path,
    # but a full-precision f32 residual + bias (as the kernel computes).
    ref = x + jnp.dot(x.astype(jnp.bfloat16), wb,
                      preferred_element_type=jnp.float32) + b

    assert out.shape == (M, hidden)
    assert out.dtype == x.dtype
    assert jnp.allclose(out, ref, atol=2e-3, rtol=2e-3), "mismatch vs reference"

    print("KERNEL_OK")
</pallas_src>

<mosaic_0001>
module attributes {stable_mosaic.version = 11 : i64} {
  func.func @_lambda_kernel(%arg0: i32, %arg1: i32, %arg2: memref<16x256xf32, #tpu.memory_space<vmem>>, %arg3: memref<256x128xbf16, #tpu.memory_space<vmem>>, %arg4: memref<1x128xf32, #tpu.memory_space<vmem>>, %arg5: memref<16x128xf32, #tpu.memory_space<vmem>>, %arg6: memref<16x256xbf16, #tpu.memory_space<vmem>>) attributes {dimension_semantics = [#tpu.dimension_semantics<parallel>, #tpu.dimension_semantics<arbitrary>], iteration_bounds = array<i64: 2, 2>, scalar_prefetch = 0 : i64, scratch_operands = 1 : i64, tpu.core_type = #tpu.core_type<tc>, window_params = [{transform_indices = @transform_0, window_bounds = array<i64: 16, 256>}, {transform_indices = @transform_1, window_bounds = array<i64: 256, 128>}, {transform_indices = @transform_2, window_bounds = array<i64: 1, 128>}, {transform_indices = @transform_3, window_bounds = array<i64: 16, 128>}]} {
    %c0_i32 = arith.constant 0 : i32
    %0 = arith.cmpi eq, %arg1, %c0_i32 : i32
    %1 = arith.extui %0 : i1 to i32
    %c0_i32_0 = arith.constant 0 : i32
    %2 = arith.cmpi ne, %1, %c0_i32_0 : i32
    scf.if %2 {
      %c0_9 = arith.constant 0 : index
      %c0_10 = arith.constant 0 : index
      %15 = vector.load %arg2[%c0_9, %c0_10] : memref<16x256xf32, #tpu.memory_space<vmem>>, vector<16x256xf32>
      %16 = arith.truncf %15 : vector<16x256xf32> to vector<16x256xbf16>
      %c0_11 = arith.constant 0 : index
      %c0_12 = arith.constant 0 : index
      %17 = vector.load %arg6[%c0_11, %c0_12] : memref<16x256xbf16, #tpu.memory_space<vmem>>, vector<16x256xbf16>
      tpu.vector_store %arg6[%c0_11, %c0_12], %16 {strides = array<i32>} : memref<16x256xbf16, #tpu.memory_space<vmem>>, vector<16x256xbf16>,
    } else {
    }
    %c0 = arith.constant 0 : index
    %c0_1 = arith.constant 0 : index
    %3 = vector.load %arg6[%c0, %c0_1] : memref<16x256xbf16, #tpu.memory_space<vmem>>, vector<16x256xbf16>
    %c0_2 = arith.constant 0 : index
    %c0_3 = arith.constant 0 : index
    %4 = vector.load %arg3[%c0_2, %c0_3] : memref<256x128xbf16, #tpu.memory_space<vmem>>, vector<256x128xbf16>
    %cst = arith.constant dense<0.000000e+00> : vector<16x128xf32>
    %5 = tpu.matmul %3, %4, %cst {dimension_numbers = #tpu.dot_dimension_numbers<[1], [0], [0], [1], [0, 0, 1, 1], [], []>} : vector<16x256xbf16>, vector<256x128xbf16>, vector<16x128xf32> -> vector<16x128xf32>
    %c128_i32 = arith.constant 128 : i32
    %6 = arith.muli %arg1, %c128_i32 : i32
    %7 = tpu.assume_multiple %6, 128 : i32
    %c0_4 = arith.constant 0 : index
    %8 = arith.index_cast %7 : i32 to index
    %9 = vector.load %arg2[%c0_4, %8] : memref<16x256xf32, #tpu.memory_space<vmem>>, vector<16x128xf32>
    %10 = arith.addf %9, %5 : vector<16x128xf32>
    %c0_5 = arith.constant 0 : index
    %c0_6 = arith.constant 0 : index
    %11 = vector.load %arg4[%c0_5, %c0_6] : memref<1x128xf32, #tpu.memory_space<vmem>>, vector<1x128xf32>
    %12 = vector.broadcast %11 : vector<1x128xf32> to vector<16x128xf32>
    %13 = arith.addf %10, %12 : vector<16x128xf32>
    %c0_7 = arith.constant 0 : index
    %c0_8 = arith.constant 0 : index
    %14 = vector.load %arg5[%c0_7, %c0_8] : memref<16x128xf32, #tpu.memory_space<vmem>>, vector<16x128xf32>
    tpu.vector_store %arg5[%c0_7, %c0_8], %13 {strides = array<i32>} : memref<16x128xf32, #tpu.memory_space<vmem>>, vector<16x128xf32>,
    return
  }
  func.func @transform_0(%arg0: i32, %arg1: i32) -> (i32, i32) {
    %c0_i32 = arith.constant 0 : i32
    %c0_i32_0 = arith.constant 0 : i32
    return %arg0, %c0_i32 : i32, i32
  }
  func.func @transform_1(%arg0: i32, %arg1: i32) -> (i32, i32) {
    %c0_i32 = arith.constant 0 : i32
    %c0_i32_0 = arith.constant 0 : i32
    return %c0_i32, %arg1 : i32, i32
  }
  func.func @transform_2(%arg0: i32, %arg1: i32) -> (i32, i32) {
    %c0_i32 = arith.constant 0 : i32
    %c0_i32_0 = arith.constant 0 : i32
    return %c0_i32, %arg1 : i32, i32
  }
  func.func @transform_3(%arg0: i32, %arg1: i32) -> (i32, i32) {
    %c0_i32 = arith.constant 0 : i32
    return %arg0, %arg1 : i32, i32
  }
}

</mosaic_0001>

<bundles_post_ra>
// kernel: tpu_custom_call.1
= control target key start
LH: loop header
LB: loop body
LE: loop exit
PB: predicated region body
PF: predicated region fallthrough
CT: control target
= control target key end

     0   :  { %s1463_s0 = inlined_call_operand.hbm [shape: f32[18,256], index: 0, kind: input, shape index: {}]   ;;  %s1464_s1 = inlined_call_operand.hbm [shape: bf16[256,256], index: 1, kind: input, shape index: {}]   ;;  %s1465_s2 = inlined_call_operand.vmem [shape: f32[1,256], index: 2, kind: input, shape index: {}]   ;;  %s1466_s3 = inlined_call_operand.hbm [shape: f32[18,256], index: 3, kind: output, shape index: {}]  }
   0x1   :  { %1474 = sst [smem:[#allocation20_spill]] %s1463_s0 }
   0x2   :  { %8 = vsyncpa [#allocation4], 0 }
   0x3   :  { %10 = vsyncpa [#allocation4 + $0x1], 0 }
   0x4   :  { %11 = vsyncpa [#allocation7], 0 }
   0x5   :  { %13 = vsyncpa [#allocation7 + $0x1], 0 }
   0x6   :  { %14 = vsyncpa [#allocation5], 0 }
   0x7   :  { %16 = vsyncpa [#allocation5 + $0x1], 0  ;;  %s1080_s12 = smov 0   ;;  %s1082_s13 = smov 0  }
   0x8   :  { %s1084_s14 = smov 0   ;;  %s1086_s15 = smov 0  }
   0x9   :  { %s1088_s16 = smov 0   ;;  %s1090_s17 = smov 0  }
   0xa   :  { %s1092_s18 = smov 0   ;;  %s1094_s19 = smov 0  }
   0xb   :  { %s1096_s20 = smov 0   ;;  %s1098_s21 = smov 0  }
   0xc   :  { %s1100_s22 = smov 0   ;;  %s1102_s23 = smov 0  }
   0xd   :  { %s1104_s24 = smov 0   ;;  %s1106_s25 = smov 0  }
   0xe LB: > { %1475 = sst [smem:[#allocation12_spill]] %s1003_s14  ;;  %s1467_s26 = sadd.s32 4294967295, %s1047_s25   ;;  %s1047_s25 = sphi %s1106_s25, %s22_s25   ;;  %s1043_s24 = sphi %s1104_s24, %s1504_s24   ;;  %s1039_s23 = sphi %s1102_s23, %s1516_s23   ;;  %s1035_s22 = sphi %s1100_s22, %s1502_s22   ;;  %s1031_s21 = sphi %s1098_s21, %s1515_s21   ;;  %s1027_s20 = sphi %s1096_s20, %s1514_s20   ;;  %s1023_s19 = sphi %s1094_s19, %s1513_s19   ;;  %s1019_s18 = sphi %s1092_s18, %s1512_s18   ;;  %s1015_s17 = sphi %s1090_s17, %s1511_s17   ;;  %s1011_s16 = sphi %s1088_s16, %s1510_s16   ;;  %s1007_s15 = sphi %s1086_s15, %s1509_s15   ;;  %s1003_s14 = sphi %s1084_s14, %s1508_s14   ;;  %s999_s13 = sphi %s1082_s13, %s1507_s13   ;;  %s995_s12 = sphi %s1080_s12, %s1506_s12  }
   0xf   : > { %1476 = sst [smem:[#allocation13_spill]] %s1027_s20  ;;  %s31_s28 = sadd.s32 1, %s1039_s23 }
  0x10   : > { %1477 = sst [smem:[#allocation14_spill]] %s1043_s24  ;;  %s34_s29 = sadd.s32 1, %s1043_s24 }
  0x11   : > { %p32_p0 = scmp.ge.s32.totalorder %s31_s28, 2  ;;  %s41_s30 = sadd.s32 1, %s1027_s20 }
  0x12   : > { %p48_p1 = scmp.ne.s32.totalorder %s1027_s20, %s1023_s19  ;;  %p49_p2 = scmp.eq.s32.totalorder %s1047_s25, 0 }
  0x13   : > { %s1518_s28 = smov (%p32_p0, %s31_s28), 0  ;;  %s1520_s29 = smov (!%p32_p0, %s34_s29), %s1043_s24 }
  0x14   : > { %1478 = sst [smem:[#allocation15_spill]] %s1518_s28  ;;  %p1161_p3 = por %p49_p2, %p48_p1 }
  0x15   : > { %p54_p4 = scmp.ne.s32.totalorder %s1023_s19, %s1019_s18  ;;  %p36_p5 = scmp.ge.s32.totalorder %s1520_s29, 2 }
  0x16   : > { %p1168_p6 = scmp.eq.s32.totalorder %s1467_s26, 0  ;;  %s64_s6 = ssub.s32 %s1039_s23, %s1518_s28 }
  0x17   : > { %s67_s7 = sadd.s32 1, %s1015_s17  ;;  %s1522_s29 = smov (%p36_p5, %s1520_s29), 0 }
  0x18   : > { %1481 = sst [smem:[#allocation16_spill]] %s1522_s29  ;;  %p1179_p7 = por %p1168_p6, %p54_p4 }
  0x19   : > { %p65_p8 = scmp.eq.s32.totalorder %s64_s6, 0  ;;  %s38_s9 = ssub.s32 %s1043_s24, %s1522_s29 }
  0x1a   : > { %p74_p9 = scmp.ne.s32.totalorder %s1015_s17, %s1011_s16  ;;  %p39_p10 = scmp.eq.s32.totalorder %s38_s9, 0 }
  0x1b   : > { %p80_p11 = scmp.ne.s32.totalorder %s1011_s16, %s1007_s15  ;;  %s118_s26 = sor.u32 %s64_s6, %s38_s9 }
  0x1c   : > { %s1190_s10 = scalar_select %p65_p8, %s1015_s17, %s67_s7  }
  0x1d   : > { %s1193_s11 = scalar_select %p39_p10, %s1027_s20, %s41_s30  }
  0x1e   : > { %1483 = sst [smem:[#allocation17_spill]] %s1190_s10  ;;  %p1197_p12 = por %p74_p9, %p49_p2 }
  0x1f   : > { %1484 = sst [smem:[#allocation18_spill]] %s1193_s11  ;;  %p1203_p13 = por %p80_p11, %p1168_p6 }
  0x20   : > { %s121_s29 = sadd.s32 1, %s1003_s14  ;;  %p119_p0 = scmp.eq.s32.totalorder %s118_s26, 0 }
  0x21   : > { %s1486_s27 = scalar_select %p1203_p13, 1, 0 }
  0x22   : > { %p131_p1 = scmp.ne.s32.totalorder %s1003_s14, %s999_s13  ;;  %s1487_s28 = sadd.s32 4294967295, %s1047_s25  }
  0x23   : > { %p132_p4 = scmp.eq.s32.totalorder %s1487_s28, 3  ;;  %p137_p5 = scmp.ne.s32.totalorder %s999_s13, %s995_s12 }
  0x24   : > { %s1215_s15 = scalar_select %p119_p0, %s1003_s14, %s121_s29  }
  0x25   : > { %p1217_p8 = por %p132_p4, %p131_p1  ;;  %s1490_s7 = sadd.s32 4294967294, %s1047_s25  }
  0x26   : > { %1488 = sst [smem:[#allocation19_spill]] %s1215_s15  ;;  %p138_p2 = scmp.eq.s32.totalorder %s1490_s7, 3 }
  0x27   : > { %s1489_s30 = scalar_select %p1217_p8, 1, 0 }
  0x28   : > { %p1223_p9 = por %p138_p2, %p137_p5  ;;  %p624_p6 = scmp.ge.s32.totalorder %s1047_s25, 4 }
  0x2a   : > { %s1491_s5 = scalar_select %p1223_p9, 1, 0 }
  0x2b   : > { %154 = sbr.rel (%p624_p6) target bundleno = 117 (0x75), region = 16 }
  0x32   : > { %157 = sbr.rel (!%p1161_p3) target bundleno = 90 (0x5a), region = 20  ;;  %s158_s26 = sand.u32 (%p1161_p3), 1, %s1027_s20  }
  0x33   : > { %s626_s28 = sshll.u32 (%p1161_p3), %s1043_s24, 1  ;;  %s625_s29 = sshll.u32 (%p1161_p3), %s158_s26, 5 }
  0x34   : > { %s164_s6 = ssub.s32 (%p1161_p3), 3, %s626_s28  ;;  %s1235_s11 = scalar_lea.sflag (%p1161_p3), [#allocation4], %s158_s26 }
  0x35   : > { %p165_p10 = scmp.lt.s32.totalorder (%p1161_p3), %s164_s6, 2  ;;  %s162_s10 = scalar_lea.vmem (%p1161_p3), [#allocation3], %s625_s29 }
  0x39   : > { %s1524_s6 = smov (!%p165_p10, %s164_s6), 2 }
  0x3a   : > { %s1232_s9 = sshll.u32 %s1524_s6, 8 }
  0x3b   : > { %s170_s7 = ssub.s32 512, %s1232_s9 }
  0x3c   : > { %171 = vsyncadd %s1235_s11, %s170_s7  ;;  %p629_p3 = scmp.ne.s32.totalorder %s1232_s9, 0  ;;  %s672_s4 = sshll.u32 %s1043_s24, 9 }
  0x3d   : > { %s1492_s0 = sld [smem:[#allocation20_spill]]  ;;  %s177_s26 = sshll.u32 %s162_s10, 4  ;;  %s1245_s26 = int_to_ptr.vmem [resolvable:$true] %s177_s26 }
  0x43   : > { %s1243_s28 = scalar_lea.hbm %s1492_s0, %s672_s4  ;;  %s845_s24 = scalar_lea.hbm %s1492_s0, 768 }
  0x44   : > { %s841_s29 = scalar_lea.hbm %s1243_s28, %s1232_s9  ;;  %p846_p4 = scmp.lt.u32.totalorder %s1243_s28, %s1492_s0 }
  0x45   : > { %p842_p11 = scmp.ne.s32.totalorder %s1243_s28, %s841_s29  ;;  %p847_p5 = scmp.lt.u32.totalorder %s845_s24, %s841_s29 }
  0x46   : > { %p849_p6 = scmp.lt.u32.totalorder %s841_s29, %s1243_s28 }
  0x47   : > { %p843_p0 = pnand %p842_p11, %p629_p3  ;;  %p848_p2 = por %p847_p5, %p846_p4 }
  0x49   : > { %p844_p1 = pneg %p843_p0  ;;  %p850_p10 = por %p849_p6, %p848_p2 }
  0x4b   : > { %p851_p9 = pnand %p850_p10, %p844_p1 }
  0x4d   : > { %854 = shalt.err (!%p851_p9)
}
  0x4e   : > { %s855_s10 = scalar_lea.vmem %s1245_s26, %s1232_s9  ;;  %s1049_s15 = smov [#allocation3]  }
  0x4f   : > { %p856_p11 = scmp.ne.s32.totalorder %s1245_s26, %s855_s10  ;;  %s859_s4 = sshll.u32 %s1049_s15, 4  ;;  %s860_s4 = int_to_ptr.vmem [resolvable:$false] %s859_s4 }
  0x50   : > { %s861_s14 = scalar_lea.vmem %s860_s4, 1024  ;;  %p862_p13 = scmp.lt.s32.totalorder %s1245_s26, %s860_s4 }
  0x51   : > { %p857_p0 = pnand %p856_p11, %p629_p3  ;;  %p863_p4 = scmp.lt.s32.totalorder %s861_s14, %s855_s10 }
  0x53   : > { %p858_p8 = pneg %p857_p0  ;;  %p864_p5 = por %p863_p4, %p862_p13 }
  0x55   : > { %p865_p2 = pnand %p864_p5, %p858_p8 }
  0x57   : > { %868 = shalt.err (!%p865_p2)
}
  0x58   : > { %s1050_s24 = smov 256   ;;  %s1051_s29 = smov 16  }
  0x59   : > { %183 = dma.hbm_to_vmem [thread:$0]  (%p629_p3), %s1243_s28, %s1232_s9, %s1245_s26, %s1235_s11, %s1050_s24, %s1050_s24, %s1051_s29  }
  0x5a PF: > { %s187_s6 = sand.u32 1, %s1015_s17   ;;  %s635_s7 = sshll.u32 %s1039_s23, 6 }
  0x5b   : > { %s634_s20 = sshll.u32 %s187_s6, 7  ;;  %s1277_s4 = scalar_lea.hbm %s1464_s1, %s635_s7 }
  0x5c   : > { %s191_s14 = scalar_lea.vmem [#allocation6], %s634_s20  ;;  %s1281_s11 = scalar_lea.sflag [#allocation7], %s187_s6 }
  0x5d   : > { %s197_s0 = sshll.u32 %s191_s14, 4  ;;  %s869_s9 = scalar_lea.hbm %s1277_s4, 2048  ;;  %s1279_s0 = int_to_ptr.vmem [resolvable:$true] %s197_s0 }
  0x5e   : > { %p870_p13 = scmp.ne.s32.totalorder %s1277_s4, %s869_s9  ;;  %s873_s24 = scalar_lea.hbm %s1464_s1, 4096 }
  0x5f   : > { %p874_p3 = scmp.lt.u32.totalorder %s1277_s4, %s1464_s1  ;;  %p875_p1 = scmp.lt.u32.totalorder %s873_s24, %s869_s9 }
  0x60   : > { %p871_p8 = pnand %p870_p13, %p1197_p12  ;;  %p877_p10 = scmp.lt.u32.totalorder %s869_s9, %s1277_s4 }
  0x61   : > { %p876_p6 = por %p875_p1, %p874_p3 }
  0x62   : > { %p872_p9 = pneg %p871_p8 }
  0x63   : > { %p878_p11 = por %p877_p10, %p876_p6 }
  0x65   : > { %p879_p0 = pnand %p878_p11, %p872_p9 }
  0x67   : > { %882 = shalt.err (!%p879_p0)
}
  0x68   : > { %s883_s6 = scalar_lea.vmem %s1279_s0, 2048  ;;  %s1052_s20 = smov [#allocation6]  }
  0x69   : > { %p884_p4 = scmp.ne.s32.totalorder %s1279_s0, %s883_s6  ;;  %s887_s10 = sshll.u32 %s1052_s20, 4  ;;  %s888_s10 = int_to_ptr.vmem [resolvable:$false] %s887_s10 }
  0x6a   : > { %s889_s15 = scalar_lea.vmem %s888_s10, 4096  ;;  %p890_p13 = scmp.lt.s32.totalorder %s1279_s0, %s888_s10 }
  0x6b   : > { %p885_p5 = pnand %p884_p4, %p1197_p12  ;;  %p891_p8 = scmp.lt.s32.totalorder %s889_s15, %s883_s6 }
  0x6d   : > { %p886_p2 = pneg %p885_p5  ;;  %p892_p3 = por %p891_p8, %p890_p13 }
  0x6f   : > { %p893_p1 = pnand %p892_p3, %p886_p2 }
  0x71   : > { %896 = shalt.err (!%p893_p1)
}
  0x72   : > { %s1053_s14 = smov 128   ;;  %s1054_s9 = smov 64  }
  0x73   : > { %s1055_s28 = smov 4  }
  0x74   : > { %696 = dma.hbm_to_vmem [thread:$0]  (%p1197_p12), %s1277_s4, 2048, %s1279_s0, %s1281_s11, %s1053_s14, %s1054_s9, %s1055_s28  }
  0x75 PF: > { %p636_p9 = scmp.ge.s32.totalorder %s1047_s25, 1  ;;  %p211_p6 = scmp.lt.s32.totalorder %s1047_s25, 5 }
  0x77   : > { %p212_p10 = pnand %p636_p9, %p211_p6 }
  0x78   : > { %s217_s26 = sand.u32 (!%p212_p10), 1, %s1023_s19  }
  0x79   : > { %215 = sbr.rel (%p212_p10) target bundleno = 429 (0x1ad), region = 32  ;;  %s637_s24 = sshll.u32 (!%p212_p10), %s217_s26, 5 }
  0x7a   : > { %s218_s29 = scalar_lea.sflag (!%p212_p10), [#allocation4], %s217_s26  ;;  %s1308_s7 = scalar_lea.vmem (!%p212_p10), [#allocation3], %s637_s24 }
  0x80   : > { %982 = dma.done.wait (%p1179_p7), %s218_s29, 512  }
  0x81   : > { %984 = vsyncadd (%p1179_p7), %s218_s29, 4294966784  ;;  %s226_s0 = sand.u32 1, %s1011_s16   ;;  %p1493_p12 = scmp.ne.s32.totalorder %s1486_s27, 0 }
  0x82   : > { %s638_s18 = sshll.u32 %s226_s0, 7  ;;  %s227_s4 = scalar_lea.sflag [#allocation7], %s226_s0 }
  0x83   : > { %s1315_s11 = scalar_lea.vmem [#allocation6], %s638_s18 }
  0x84   : > { %986 = dma.done.wait (%p1493_p12), %s227_s4, 2048  }
  0x85   : > { %988 = vsyncadd (%p1493_p12), %s227_s4, 4294965248  ;;  %s258_s6 = sand.u32 1, %s999_s13   ;;  %p267_p11 = scmp.lt.s32.totalorder %s1031_s21, 1 }
  0x86   : > { %s639_s8 = sshll.u32 %s258_s6, 4  ;;  %p640_p7 = scmp.ne.s32.totalorder %s1031_s21, 0 }
  0x87   : > { %s1326_s20 = scalar_select %p267_p11, %s1031_s21, 1 }
  0x88   : > { %s1332_s9 = scalar_lea.vmem [#allocation8], %s639_s8  ;;  %279 = sbr.rel (%p640_p7) target bundleno = 143 (0x8f), region = 44  ;;  %v280_v0 = vld [vmem:[%s1308_s7] sm:$0xff] (!%p640_p7)  ;;  %v282_v1 = vld [vmem:[%s1308_s7 + $0x10] sm:$0xff] (!%p640_p7)  ;;  %v281_v2 = vld [vmem:[%s1308_s7 + $0x8] sm:$0xff] (!%p640_p7) }
  0x89   : > { %s269_s14 = scalar_lea.vmem %s1465_s2, %s1326_s20  ;;  %v284_v3 = vpack.c.bf16 (!%p640_p7), %v282_v1, %v280_v0  ;;  %v283_v4 = vld [vmem:[%s1308_s7 + $0x18] sm:$0xff] (!%p640_p7) }
  0x8a   : > { %v285_v5 = vpack.c.bf16 (!%p640_p7), %v283_v4, %v281_v2 }
  0x8b   : > { %286 = vst [vmem:[#allocation2] sm:$0xff] (!%p640_p7), %v284_v3 }
  0x8c   : > { %287 = vst [vmem:[#allocation2 + $0x8] sm:$0xff] (!%p640_p7), %v285_v5 }
  0x8f PF: > { %v825_v6 = vld [vmem:[%s1315_s11 + $0x40] sm:$0xff]   ;;  %v827_v8 = vld [vmem:[%s1315_s11 + $0x48] sm:$0xff]   ;;  %v829_v10 = vld [vmem:[%s1315_s11 + $0x50] sm:$0xff]   ;;  %s657_s27 = sshll.u32 %s1031_s21, 7  ;;  %p1494_p0 = scmp.ne.s32.totalorder %s1489_s30, 0 }
  0x90   : > { %v826_v7 = vld [vmem:[%s1315_s11] sm:$0xff]   ;;  %674 = vmatprep.subr.bf16.mxu0 %v825_v6  ;;  %v828_v9 = vld [vmem:[%s1315_s11 + $0x8] sm:$0xff]   ;;  %v830_v11 = vld [vmem:[%s1315_s11 + $0x10] sm:$0xff]   ;;  %s460_s28 = sshra.s32 %s657_s27, 7  ;;  %s661_s18 = sshll.u32 (%p1494_p0), %s1035_s22, 1 }
  0x91   : > { %675 = vmatpush3.bf16.msra.mxu0 %v826_v7  ;;  %v831_v12 = vld [vmem:[%s1315_s11 + $0x58] sm:$0xff]   ;;  %v833_v14 = vld [vmem:[%s1315_s11 + $0x60] sm:$0xff]   ;;  %v835_v16 = vld [vmem:[%s1315_s11 + $0x68] sm:$0xff]   ;;  %s658_s26 = sshll.u32 %s460_s28, 3  ;;  %s488_s4 = ssub.s32 (%p1494_p0), 3, %s661_s18 }
  0x92   : > { %676 = vmatprep.subr.bf16.mxu0 %v827_v8  ;;  %v832_v13 = vld [vmem:[%s1315_s11 + $0x18] sm:$0xff]   ;;  %v834_v15 = vld [vmem:[%s1315_s11 + $0x20] sm:$0xff]   ;;  %v836_v18 = vld [vmem:[%s1315_s11 + $0x28] sm:$0xff]   ;;  %s463_s24 = scalar_lea.vmem %s1308_s7, %s658_s26 [#allocation3]  ;;  %s1366_s7 = scalar_lea.sflag [#allocation5], %s258_s6 }
  0x93   : > { %v289_v17 = vld [vmem:[#allocation2 + $0x8] sm:$0xff]  ;;  %v837_v19 = vld [vmem:[%s1315_s11 + $0x70] sm:$0xff]   ;;  %v465_v31 = vld [vmem:[%s463_s24 + $0x10] sm:$0xff]  ;;  %p489_p4 = scmp.lt.s32.totalorder (%p1494_p0), %s488_s4, 2 }
  0x94   : > { %450 = vmatprep.mubr.bf16.mxu0 %v289_v17  ;;  %v838_v20 = vld [vmem:[%s1315_s11 + $0x30] sm:$0xff]   ;;  %v839_v21 = vld [vmem:[%s1315_s11 + $0x78] sm:$0xff]  }
  0x95   : > { %677 = vmatpush3.bf16.msra.mxu0 %v828_v9  ;;  %v840_v22 = vld [vmem:[%s1315_s11 + $0x38] sm:$0xff]   ;;  %v288_v23 = vld [vmem:[#allocation2] sm:$0xff] }
  0x96   : > { %678 = vmatprep.subr.bf16.mxu0 %v829_v10  ;;  %v464_v26 = vld [vmem:[%s463_s24] sm:$0xff] }
  0x97   : > { %v659_v29 = vld [vmem:[%s269_s14] ss:$0 sm:$0xff] }
  0x99   : > { %679 = vmatpush3.bf16.msra.mxu0 %v830_v11 }
  0x9a   : > { %680 = vmatprep.subr.bf16.mxu0 %v831_v12 }
  0x9d   : > { %681 = vmatpush3.bf16.msra.mxu0 %v832_v13 }
  0x9e   : > { %682 = vmatprep.subr.bf16.mxu0 %v833_v14 }
  0xa1   : > { %683 = vmatpush3.bf16.msra.mxu0 %v834_v15 }
  0xa2   : > { %684 = vmatprep.subr.bf16.mxu0 %v835_v16 }
  0xa5   : > { %685 = vmatpush3.bf16.msra.mxu0 %v836_v18 }
  0xa6   : > { %686 = vmatprep.subr.bf16.mxu0 %v837_v19 }
  0xa9   : > { %687 = vmatpush3.bf16.msra.mxu0 %v838_v20 }
  0xaa   : > { %688 = vmatprep.subr.bf16.mxu0 %v839_v21 }
  0xad   : > { %689 = vmatpush3.bf16.msra.mxu0 %v840_v22 }
  0xb0   : > { %451 = vmatmul.mubr.bf16.vlgmr.msra.gmra.mrb[0].mxu0 %v288_v23 }
 0x183   : > { %v690_v24 = vpop.f32.mrb[0].mxu0 }
 0x184   : > { %v691_v25 = vpop.f32.mrb[1].mxu0 }
 0x185   : > { %v692_v27 = vadd.f32 %v691_v25, %v690_v24  ;;  %v693_v28 = vpop.f32.mrb[2].mxu0 }
 0x186   : > { %v694_v30 = vpop.f32.mrb[3].mxu0 }
 0x187   : > { %v466_v32 = vadd.f32 %v692_v27, %v464_v26  ;;  %v695_v33 = vadd.f32 %v694_v30, %v693_v28  ;;  %486 = sbr.rel (!%p1494_p0) target bundleno = 429 (0x1ad), region = 48 }
 0x189   : > { %v475_v34 = vadd.f32 %v659_v29, %v466_v32  ;;  %v467_v35 = vadd.f32 %v695_v33, %v465_v31 }
 0x18b   : > { %477 = vst [vmem:[%s1332_s9] sm:$0xff] %v475_v34  ;;  %v476_v36 = vadd.f32 %v659_v29, %v467_v35 }
 0x18d   : > { %478 = vst [vmem:[%s1332_s9 + $0x8] sm:$0xff] %v476_v36 }
 0x18e   : > { %s1526_s4 = smov (!%p489_p4, %s488_s4), 2 }
 0x18f   : > { %s1371_s11 = sshll.u32 %s1526_s4, 7 }
 0x190   : > { %s493_s8 = ssub.s32 256, %s1371_s11 }
 0x191   : > { %494 = vsyncadd %s1366_s7, %s493_s8  ;;  %p663_p5 = scmp.ne.s32.totalorder %s1371_s11, 0  ;;  %s673_s30 = sshll.u32 %s1035_s22, 2 }
 0x192   : > { %s497_s6 = sadd.s32 %s1031_s21, %s673_s30  ;;  %s501_s20 = sshll.u32 %s1332_s9, 4  ;;  %s1379_s20 = int_to_ptr.vmem [resolvable:$true] %s501_s20 }
 0x193   : > { %s665_s10 = sshll.u32 %s497_s6, 7  ;;  %s897_s28 = scalar_lea.vmem %s1379_s20, %s1371_s11 }
 0x194   : > { %s1384_s27 = scalar_lea.hbm %s1466_s3, %s665_s10  ;;  %p898_p2 = scmp.ne.s32.totalorder %s1379_s20, %s897_s28 }
 0x195   : > { %s1056_s26 = smov [#allocation8]  }
 0x196   : > { %p899_p13 = pnand %p898_p2, %p663_p5  ;;  %s901_s22 = sshll.u32 %s1056_s26, 4  ;;  %s902_s22 = int_to_ptr.vmem [resolvable:$false] %s901_s22 }
 0x197   : > { %s903_s21 = scalar_lea.vmem %s902_s22, 512  ;;  %p904_p3 = scmp.lt.s32.totalorder %s1379_s20, %s902_s22 }
 0x198   : > { %p900_p8 = pneg %p899_p13  ;;  %p905_p1 = scmp.lt.s32.totalorder %s903_s21, %s897_s28 }
 0x19a   : > { %p906_p9 = por %p905_p1, %p904_p3 }
 0x19c   : > { %p907_p6 = pnand %p906_p9, %p900_p8 }
 0x19e   : > { %910 = shalt.err (!%p907_p6)
}
 0x19f   : > { %s911_s9 = scalar_lea.hbm %s1384_s27, %s1371_s11  ;;  %s915_s0 = scalar_lea.hbm %s1466_s3, 768 }
 0x1a0   : > { %p912_p10 = scmp.ne.s32.totalorder %s1384_s27, %s911_s9  ;;  %p916_p7 = scmp.lt.u32.totalorder %s1384_s27, %s1466_s3 }
 0x1a1   : > { %p917_p0 = scmp.lt.u32.totalorder %s915_s0, %s911_s9  ;;  %p919_p2 = scmp.lt.u32.totalorder %s911_s9, %s1384_s27 }
 0x1a2   : > { %p913_p12 = pnand %p912_p10, %p663_p5 }
 0x1a3   : > { %p918_p4 = por %p917_p0, %p916_p7 }
 0x1a4   : > { %p914_p11 = pneg %p913_p12 }
 0x1a5   : > { %p920_p13 = por %p919_p2, %p918_p4 }
 0x1a7   : > { %p921_p8 = pnand %p920_p13, %p914_p11 }
 0x1a9   : > { %924 = shalt.err (!%p921_p8)
}
 0x1aa   : > { %s1057_s8 = smov 128   ;;  %s1058_s30 = smov 256  }
 0x1ab   : > { %s1059_s6 = smov 8  }
 0x1ac   : > { %507 = dma.vmem_to_hbm [thread:$0]  (%p663_p5), %s1379_s20, %s1371_s11, %s1384_s27, %s1366_s7, %s1057_s8, %s1058_s30, %s1059_s6  }
 0x1ad PF: > { %p704_p3 = scmp.ge.s32.totalorder %s1047_s25, 2  ;;  %s516_s10 = sand.u32 1, %s995_s12  }
 0x1ae   : > { %p1495_p1 = scmp.ne.s32.totalorder %s1491_s5, 0  ;;  %s517_s15 = scalar_lea.sflag [#allocation5], %s516_s10 }
 0x1b0   : > { %p701_p9 = pnand %p704_p3, %p1495_p1 }
 0x1b2   : > { %990 = dma.done.wait (!%p701_p9), %s517_s15, 256  }
 0x1b3   : > { %992 = vsyncadd (!%p701_p9), %s517_s15, 4294967040  ;;  %s22_s25 = sadd.s32 1, %s1047_s25   ;;  %s1497_s7 = sld [smem:[#allocation12_spill]] }
 0x1b4   : > { %p1416_p6 = scmp.ge.s32.totalorder %s22_s25, 6   ;;  %s1498_s11 = sld [smem:[#allocation19_spill]] }
 0x1b5   : > { %s1499_s20 = sld [smem:[#allocation17_spill]]  ;;  %s1500_s27 = sld [smem:[#allocation13_spill]] }
 0x1b6   : > { %s1501_s28 = sld [smem:[#allocation18_spill]]  ;;  %s1502_s22 = sld [smem:[#allocation14_spill]] }
 0x1b7   : > { %s1503_s5 = sld [smem:[#allocation15_spill]]  ;;  %s1504_s24 = sld [smem:[#allocation16_spill]] }
 0x1b8   : > { %s1506_s12 = smov %s999_s13  ;;  %s1509_s15 = smov %s1011_s16 }
 0x1b9   : > { %s1507_s13 = smov %s1497_s7  ;;  %s1510_s16 = smov %s1015_s17 }
 0x1ba   : > { %s1508_s14 = smov %s1498_s11  ;;  %s1512_s18 = smov %s1023_s19 }
 0x1bb   : > { %s1511_s17 = smov %s1499_s20  ;;  %s1513_s19 = smov %s1500_s27 }
 0x1bc   : > { %s1514_s20 = smov %s1501_s28  ;;  %s1515_s21 = smov %s1039_s23 }
 0x1bd   : > { %s1516_s23 = smov %s1503_s5  ;;  %21 = sbr.rel (!%p1416_p6) target bundleno = 14 (0xe), region = 98 }
 0x1c4   :  { %522 = vsyncpa [#allocation4], 1 }
 0x1c5   :  { %524 = vsyncpa [#allocation4 + $0x1], 1 }
 0x1c6   :  { %525 = vsyncpa [#allocation7], 1 }
 0x1c7   :  { %527 = vsyncpa [#allocation7 + $0x1], 1 }
 0x1c8   :  { %528 = vsyncpa [#allocation5], 1 }
 0x1c9   :  { %530 = vsyncpa [#allocation5 + $0x1], 1 }

</bundles_post_ra>
